<compile_context>
chip_gen: v6e
topology: v6e:2x2x1
jax: 0.10.0
libtpu: 0.0.40
codegen_flags: <defaults>
</compile_context>

<pallas_src>
import jax
import jax.numpy as jnp
from jax.experimental import pallas as pl
from jax.experimental.pallas import tpu as pltpu


# ----------------------------- Fused MLP kernel -----------------------------
def _mlp_kernel(x_ref, w1_ref, b1_ref, w2_ref, b2_ref, w3_ref, b3_ref, o_ref):
    # fc1 + ReLU
    h = jnp.dot(x_ref[...], w1_ref[...], preferred_element_type=jnp.float32)
    h = jnp.maximum(h + b1_ref[...], 0.0)
    # dropout1 -> identity (inference)
    # fc2 + ReLU
    h = jnp.dot(h, w2_ref[...], preferred_element_type=jnp.float32)
    h = jnp.maximum(h + b2_ref[...], 0.0)
    # dropout2 -> identity (inference)
    # fc3 (logits)
    y = jnp.dot(h, w3_ref[...], preferred_element_type=jnp.float32) + b3_ref[...]
    o_ref[...] = y.astype(o_ref.dtype)


def mlp_forward(params, x, *, block_b=256):
    """x: (B, input_dim) f32 -> logits (B, num_classes) f32, fused in one pallas_call."""
    (w1, b1), (w2, b2), (w3, b3) = params["fc1"], params["fc2"], params["fc3"]
    B, D = x.shape
    H1 = w1.shape[1]
    H2 = w2.shape[1]
    C = w3.shape[1]

    # Batch tile: a multiple of 8 sublanes when tiling, otherwise the full batch
    # (block_shape == full array dim is always legal).
    if B > block_b and B % block_b == 0:
        tb = block_b
    else:
        tb = B
    grid = (B // tb,)

    return pl.pallas_call(
        _mlp_kernel,
        out_shape=jax.ShapeDtypeStruct((B, C), jnp.float32),
        grid_spec=pltpu.PrefetchScalarGridSpec(
            num_scalar_prefetch=0,
            grid=grid,
            in_specs=[
                pl.BlockSpec((tb, D), lambda i: (i, 0)),    # activations: tiled over batch
                pl.BlockSpec((D, H1), lambda i: (0, 0)),    # weights/biases: VMEM-resident
                pl.BlockSpec((1, H1), lambda i: (0, 0)),
                pl.BlockSpec((H1, H2), lambda i: (0, 0)),
                pl.BlockSpec((1, H2), lambda i: (0, 0)),
                pl.BlockSpec((H2, C), lambda i: (0, 0)),
                pl.BlockSpec((1, C), lambda i: (0, 0)),
            ],
            out_specs=pl.BlockSpec((tb, C), lambda i: (i, 0)),
        ),
        compiler_params=pltpu.CompilerParams(
            dimension_semantics=("parallel",)),
    )(x, w1, b1.reshape(1, H1), w2, b2.reshape(1, H2), w3, b3.reshape(1, C))


# ----------------------------- Parameters -----------------------------
INPUT_DIM = 60
HIDDEN_DIM1 = 256
HIDDEN_DIM2 = 128
NUM_CLASSES = 2


def init_params(key):
    """Weights stored as (in_features, out_features) — transpose of PyTorch's layout."""
    dims = [(INPUT_DIM, HIDDEN_DIM1), (HIDDEN_DIM1, HIDDEN_DIM2),
            (HIDDEN_DIM2, NUM_CLASSES)]
    names = ["fc1", "fc2", "fc3"]
    params = {}
    for name, (kin, kout) in zip(names, dims):
        key, kw, kb = jax.random.split(key, 3)
        bound = 1.0 / (kin ** 0.5)   # matches nn.Linear default init range
        w = jax.random.uniform(kw, (kin, kout), jnp.float32, -bound, bound)
        b = jax.random.uniform(kb, (kout,), jnp.float32, -bound, bound)
        params[name] = (w, b)
    return params


# ----------------------------- Pure-JAX reference -----------------------------
def mlp_reference(params, x):
    (w1, b1), (w2, b2), (w3, b3) = params["fc1"], params["fc2"], params["fc3"]
    h = jnp.maximum(x @ w1 + b1, 0.0)
    h = jnp.maximum(h @ w2 + b2, 0.0)
    return h @ w3 + b3


if __name__ == "__main__":
    key = jax.random.PRNGKey(0)
    kp, kx = jax.random.split(key)
    params = init_params(kp)

    B = 2
    x = jax.random.normal(kx, (B, INPUT_DIM), jnp.float32)

    out = mlp_forward(params, x)
    out = jax.block_until_ready(out)

    assert out.shape == (B, NUM_CLASSES)
    assert bool(jnp.all(jnp.isfinite(out)))
    ref = mlp_reference(params, x)
    assert bool(jnp.allclose(out, ref, atol=1e-4, rtol=1e-4))
    print("KERNEL_OK")
</pallas_src>

<mosaic_0001>
module attributes {stable_mosaic.version = 11 : i64} {
  func.func @_mlp_kernel(%arg0: i32, %arg1: memref<2x60xf32, #tpu.memory_space<vmem>>, %arg2: memref<60x256xf32, #tpu.memory_space<vmem>>, %arg3: memref<1x256xf32, #tpu.memory_space<vmem>>, %arg4: memref<256x128xf32, #tpu.memory_space<vmem>>, %arg5: memref<1x128xf32, #tpu.memory_space<vmem>>, %arg6: memref<128x2xf32, #tpu.memory_space<vmem>>, %arg7: memref<1x2xf32, #tpu.memory_space<vmem>>, %arg8: memref<2x2xf32, #tpu.memory_space<vmem>>) attributes {dimension_semantics = [#tpu.dimension_semantics<parallel>], iteration_bounds = array<i64: 1>, scalar_prefetch = 0 : i64, scratch_operands = 0 : i64, tpu.core_type = #tpu.core_type<tc>, window_params = [{transform_indices = @transform_0, window_bounds = array<i64: 2, 60>}, {pipeline_mode = #tpu.pipeline_mode<synchronous>, transform_indices = @transform_1, window_bounds = array<i64: 60, 256>}, {pipeline_mode = #tpu.pipeline_mode<synchronous>, transform_indices = @transform_2, window_bounds = array<i64: 1, 256>}, {pipeline_mode = #tpu.pipeline_mode<synchronous>, transform_indices = @transform_3, window_bounds = array<i64: 256, 128>}, {pipeline_mode = #tpu.pipeline_mode<synchronous>, transform_indices = @transform_4, window_bounds = array<i64: 1, 128>}, {pipeline_mode = #tpu.pipeline_mode<synchronous>, transform_indices = @transform_5, window_bounds = array<i64: 128, 2>}, {pipeline_mode = #tpu.pipeline_mode<synchronous>, transform_indices = @transform_6, window_bounds = array<i64: 1, 2>}, {transform_indices = @transform_7, window_bounds = array<i64: 2, 2>}]} {
    %c0 = arith.constant 0 : index
    %c0_0 = arith.constant 0 : index
    %0 = vector.load %arg1[%c0, %c0_0] : memref<2x60xf32, #tpu.memory_space<vmem>>, vector<2x60xf32>
    %c0_1 = arith.constant 0 : index
    %c0_2 = arith.constant 0 : index
    %1 = vector.load %arg2[%c0_1, %c0_2] : memref<60x256xf32, #tpu.memory_space<vmem>>, vector<60x256xf32>
    %cst = arith.constant dense<0.000000e+00> : vector<2x256xf32>
    %2 = tpu.matmul %0, %1, %cst {dimension_numbers = #tpu.dot_dimension_numbers<[1], [0], [0], [1], [0, 0, 1, 1], [], []>} : vector<2x60xf32>, vector<60x256xf32>, vector<2x256xf32> -> vector<2x256xf32>
    %c0_3 = arith.constant 0 : index
    %c0_4 = arith.constant 0 : index
    %3 = vector.load %arg3[%c0_3, %c0_4] : memref<1x256xf32, #tpu.memory_space<vmem>>, vector<1x256xf32>
    %4 = vector.broadcast %3 : vector<1x256xf32> to vector<2x256xf32>
    %5 = arith.addf %2, %4 : vector<2x256xf32>
    %cst_5 = arith.constant 0.000000e+00 : f32
    %6 = vector.broadcast %cst_5 : f32 to vector<2x256xf32>
    %7 = arith.maximumf %5, %6 : vector<2x256xf32>
    %c0_6 = arith.constant 0 : index
    %c0_7 = arith.constant 0 : index
    %8 = vector.load %arg4[%c0_6, %c0_7] : memref<256x128xf32, #tpu.memory_space<vmem>>, vector<256x128xf32>
    %cst_8 = arith.constant dense<0.000000e+00> : vector<2x128xf32>
    %9 = tpu.matmul %7, %8, %cst_8 {dimension_numbers = #tpu.dot_dimension_numbers<[1], [0], [0], [1], [0, 0, 1, 1], [], []>} : vector<2x256xf32>, vector<256x128xf32>, vector<2x128xf32> -> vector<2x128xf32>
    %c0_9 = arith.constant 0 : index
    %c0_10 = arith.constant 0 : index
    %10 = vector.load %arg5[%c0_9, %c0_10] : memref<1x128xf32, #tpu.memory_space<vmem>>, vector<1x128xf32>
    %11 = vector.broadcast %10 : vector<1x128xf32> to vector<2x128xf32>
    %12 = arith.addf %9, %11 : vector<2x128xf32>
    %cst_11 = arith.constant 0.000000e+00 : f32
    %13 = vector.broadcast %cst_11 : f32 to vector<2x128xf32>
    %14 = arith.maximumf %12, %13 : vector<2x128xf32>
    %c0_12 = arith.constant 0 : index
    %c0_13 = arith.constant 0 : index
    %15 = vector.load %arg6[%c0_12, %c0_13] : memref<128x2xf32, #tpu.memory_space<vmem>>, vector<128x2xf32>
    %cst_14 = arith.constant dense<0.000000e+00> : vector<2x2xf32>
    %16 = tpu.matmul %14, %15, %cst_14 {dimension_numbers = #tpu.dot_dimension_numbers<[1], [0], [0], [1], [0, 0, 1, 1], [], []>} : vector<2x128xf32>, vector<128x2xf32>, vector<2x2xf32> -> vector<2x2xf32>
    %c0_15 = arith.constant 0 : index
    %c0_16 = arith.constant 0 : index
    %17 = vector.load %arg7[%c0_15, %c0_16] : memref<1x2xf32, #tpu.memory_space<vmem>>, vector<1x2xf32>
    %18 = vector.broadcast %17 : vector<1x2xf32> to vector<2x2xf32>
    %19 = arith.addf %16, %18 : vector<2x2xf32>
    %c0_17 = arith.constant 0 : index
    %c0_18 = arith.constant 0 : index
    %20 = vector.load %arg8[%c0_17, %c0_18] : memref<2x2xf32, #tpu.memory_space<vmem>>, vector<2x2xf32>
    tpu.vector_store %arg8[%c0_17, %c0_18], %19 {strides = array<i32>} : memref<2x2xf32, #tpu.memory_space<vmem>>, vector<2x2xf32>,
    return
  }
  func.func @transform_0(%arg0: i32) -> (i32, i32) {
    %c0_i32 = arith.constant 0 : i32
    %c0_i32_0 = arith.constant 0 : i32
    return %arg0, %c0_i32 : i32, i32
  }
  func.func @transform_1(%arg0: i32) -> (i32, i32) {
    %c0_i32 = arith.constant 0 : i32
    %c0_i32_0 = arith.constant 0 : i32
    %c0_i32_1 = arith.constant 0 : i32
    return %c0_i32, %c0_i32_0 : i32, i32
  }
  func.func @transform_2(%arg0: i32) -> (i32, i32) {
    %c0_i32 = arith.constant 0 : i32
    %c0_i32_0 = arith.constant 0 : i32
    %c0_i32_1 = arith.constant 0 : i32
    return %c0_i32, %c0_i32_0 : i32, i32
  }
  func.func @transform_3(%arg0: i32) -> (i32, i32) {
    %c0_i32 = arith.constant 0 : i32
    %c0_i32_0 = arith.constant 0 : i32
    %c0_i32_1 = arith.constant 0 : i32
    return %c0_i32, %c0_i32_0 : i32, i32
  }
  func.func @transform_4(%arg0: i32) -> (i32, i32) {
    %c0_i32 = arith.constant 0 : i32
    %c0_i32_0 = arith.constant 0 : i32
    %c0_i32_1 = arith.constant 0 : i32
    return %c0_i32, %c0_i32_0 : i32, i32
  }
  func.func @transform_5(%arg0: i32) -> (i32, i32) {
    %c0_i32 = arith.constant 0 : i32
    %c0_i32_0 = arith.constant 0 : i32
    %c0_i32_1 = arith.constant 0 : i32
    return %c0_i32, %c0_i32_0 : i32, i32
  }
  func.func @transform_6(%arg0: i32) -> (i32, i32) {
    %c0_i32 = arith.constant 0 : i32
    %c0_i32_0 = arith.constant 0 : i32
    %c0_i32_1 = arith.constant 0 : i32
    return %c0_i32, %c0_i32_0 : i32, i32
  }
  func.func @transform_7(%arg0: i32) -> (i32, i32) {
    %c0_i32 = arith.constant 0 : i32
    %c0_i32_0 = arith.constant 0 : i32
    return %arg0, %c0_i32 : i32, i32
  }
}

</mosaic_0001>

<bundles_post_ra>
// kernel: tpu_custom_call.1
= control target key start
LH: loop header
LB: loop body
LE: loop exit
PB: predicated region body
PF: predicated region fallthrough
CT: control target
= control target key end

     0   :  { %12 = vsyncpa [#allocation3], 0  ;;  %s731_s0 = inlined_call_operand.vmem [shape: f32[2,60], index: 0, kind: input, shape index: {}]   ;;  %s732_s1 = inlined_call_operand.vmem [shape: f32[60,256], index: 1, kind: input, shape index: {}]   ;;  %s733_s2 = inlined_call_operand.hbm [shape: f32[1,256], index: 2, kind: input, shape index: {}]   ;;  %s734_s3 = inlined_call_operand.hbm [shape: f32[256,128], index: 3, kind: input, shape index: {}]   ;;  %s735_s4 = inlined_call_operand.vmem [shape: f32[1,128], index: 4, kind: input, shape index: {}]   ;;  %s736_s5 = inlined_call_operand.vmem [shape: f32[128,2], index: 5, kind: input, shape index: {}]   ;;  %s737_s6 = inlined_call_operand.vmem [shape: f32[1,2], index: 6, kind: input, shape index: {}]   ;;  %s738_s7 = inlined_call_operand.hbm [shape: f32[2,2], index: 7, kind: output, shape index: {}]  }
   0x1   :  { %13 = vsyncpa [#allocation6], 0 }
   0x2   :  { %14 = vsyncpa [#allocation4], 0  ;;  %s552_s24 = smov [#allocation2]   ;;  %s553_s26 = smov [#allocation5]  }
   0x3   :  { %s25_s25 = sshll.u32 %s552_s24, 4  ;;  %s34_s27 = sshll.u32 %s553_s26, 4  ;;  %s26_s25 = int_to_ptr.vmem [resolvable:$true] %s25_s25  ;;  %s35_s27 = int_to_ptr.vmem [resolvable:$true] %s34_s27 }
   0x4   :  { %s494_s28 = scalar_lea.vmem %s26_s25, 32  ;;  %p499_p1 = scmp.lt.s32.totalorder %s26_s25, %s26_s25 }
   0x5   :  { %p495_p0 = scmp.ne.s32.totalorder %s26_s25, %s494_s28  ;;  %p500_p2 = scmp.lt.s32.totalorder %s494_s28, %s494_s28 }
   0x7   :  { %p501_p3 = por %p500_p2, %p499_p1 }
   0x9   :  { %p502_p4 = pnand %p501_p3, %p495_p0 }
   0xb   :  { %505 = shalt.err (!%p502_p4)
}
   0xc   :  { %28 = dma.hbm_to_vmem [thread:$0]  %s733_s2, 32, %s26_s25, [#allocation3]  }
   0xd   :  { %s514_s8 = scalar_lea.vmem %s35_s27, 4096  ;;  %p519_p6 = scmp.lt.s32.totalorder %s35_s27, %s35_s27 }
   0xe   :  { %p515_p5 = scmp.ne.s32.totalorder %s35_s27, %s514_s8  ;;  %p520_p7 = scmp.lt.s32.totalorder %s514_s8, %s514_s8 }
  0x10   :  { %p521_p8 = por %p520_p7, %p519_p6 }
  0x12   :  { %p522_p9 = pnand %p521_p8, %p515_p5 }
  0x14   :  { %525 = shalt.err (!%p522_p9)
}
  0x15   :  { %s554_s9 = smov 128   ;;  %s555_s10 = smov 8  }
  0x16   :  { %40 = dma.hbm_to_vmem [thread:$0]  %s734_s3, 4096, %s35_s27, [#allocation6], %s554_s9, %s554_s9, %s555_s10  }
  0x17   :  { %546 = dma.done.wait [#allocation3], 32  }
  0x18   :  { %547 = vsyncadd [#allocation3], 4294967264 }
  0x19   :  { %548 = dma.done.wait [#allocation6], 4096  }
  0x1a   :  { %549 = vsyncadd [#allocation6], 4294963200  ;;  %v556_v0 = vmov 0.0   ;;  %vm86_vm0 = vcmask 1043456   ;;  %v69_v1 = vld [vmem:[%s732_s1 + $0x78] sm:$0xf]  ;;  %v72_v61 = vlaneseq }
  0x1b   :  { %157 = vmatprep.mubr.f32.mxu0 %v556_v0  ;;  %v68_v2 = vld [vmem:[%s732_s1 + $0x70] sm:$0xf]  ;;  %v67_v3 = vld [vmem:[%s732_s1 + $0x68] sm:$0xff]  ;;  %387 = vmatprep.subr.msk.mxu0 %vm86_vm0, %v69_v1  ;;  %v66_v4 = vld [vmem:[%s732_s1 + $0x60] sm:$0xff]  ;;  %vm82_vm1 = vcmask 490496   ;;  %vm557_vm2 = vmmov 0  }
  0x1c   :  { %388 = vmatpush1.msk.msra.mxu0 %vm86_vm0, %v68_v2  ;;  %v65_v5 = vld [vmem:[%s732_s1 + $0x58] sm:$0xff]  ;;  %v64_v6 = vld [vmem:[%s732_s1 + $0x50] sm:$0xff]  ;;  %v63_v7 = vld [vmem:[%s732_s1 + $0x48] sm:$0xff]  ;;  %v73_v62 = vshrl.u32 %v72_v61, 7  ;;  %s558_s27 = smov [#allocation7]   ;;  %vm369_vm3 = vcmask 9216  }
  0x1d   :  { %111 = vmatprep.subr.mxu0 %v67_v3  ;;  %v62_v8 = vld [vmem:[%s732_s1 + $0x40] sm:$0xff]  ;;  %v61_v9 = vld [vmem:[%s732_s1 + $0x38] sm:$0xff]  ;;  %v60_v14 = vld [vmem:[%s732_s1 + $0x30] sm:$0xff] }
  0x1e   :  { %112 = vmatpush1.msra.mxu0 %v66_v4  ;;  %v197_v10 = vld [vmem:[#allocation5 + $0xf8] sm:$0xff]  ;;  %v196_v12 = vld [vmem:[#allocation5 + $0xf0] sm:$0xff]  ;;  %v195_v15 = vld [vmem:[#allocation5 + $0xe8] sm:$0xff]  ;;  %v74_v63 = vsub.s32 0, %v73_v62  ;;  %v78_v2 = vsub.s32 1, %v73_v62 }
  0x1f   :  { %113 = vmatprep.subr.mxu0 %v65_v5  ;;  %392 = vmatprep.subr.mxu1 %v197_v10  ;;  %v181_v11 = vld [vmem:[#allocation5 + $0x78] sm:$0xff]  ;;  %v180_v13 = vld [vmem:[#allocation5 + $0x70] sm:$0xff]  ;;  %v59_v16 = vld [vmem:[%s732_s1 + $0x28] sm:$0xff] }
  0x20   :  { %114 = vmatpush1.msra.mxu0 %v64_v6  ;;  %393 = vmatpush3.msra.mxu1 %v181_v11  ;;  %v179_v17 = vld [vmem:[#allocation5 + $0x68] sm:$0xff]  ;;  %v58_v18 = vld [vmem:[%s732_s1 + $0x20] sm:$0xff]  ;;  %v57_v20 = vld [vmem:[%s732_s1 + $0x18] sm:$0xff] }
  0x21   :  { %115 = vmatprep.subr.mxu0 %v63_v7  ;;  %394 = vmatprep.subr.mxu1 %v196_v12  ;;  %v194_v19 = vld [vmem:[#allocation5 + $0xe0] sm:$0xff]  ;;  %v56_v22 = vld [vmem:[%s732_s1 + $0x10] sm:$0xff]  ;;  %v193_v23 = vld [vmem:[#allocation5 + $0xd8] sm:$0xff] }
  0x22   :  { %116 = vmatpush1.msra.mxu0 %v62_v8  ;;  %395 = vmatpush3.msra.mxu1 %v180_v13  ;;  %v178_v21 = vld [vmem:[#allocation5 + $0x60] sm:$0xff]  ;;  %v177_v25 = vld [vmem:[#allocation5 + $0x58] sm:$0xff]  ;;  %v192_v27 = vld [vmem:[#allocation5 + $0xd0] sm:$0xff] }
  0x23   :  { %117 = vmatprep.subr.mxu0 %v61_v9  ;;  %396 = vmatprep.subr.mxu1 %v195_v15  ;;  %v55_v24 = vld [vmem:[%s732_s1 + $0x8] sm:$0xff]  ;;  %v54_v26 = vld [vmem:[%s732_s1] sm:$0xff]  ;;  %v176_v29 = vld [vmem:[#allocation5 + $0x50] sm:$0xff] }
  0x24   :  { %118 = vmatpush1.msra.mxu0 %v60_v14  ;;  %397 = vmatpush3.msra.mxu1 %v179_v17  ;;  %v53_v28 = vld [vmem:[%s731_s0] sm:$0x3]  ;;  %v191_v30 = vld [vmem:[#allocation5 + $0xc8] sm:$0xff]  ;;  %v190_v32 = vld [vmem:[#allocation5 + $0xc0] sm:$0xff] }
  0x25   :  { %119 = vmatprep.subr.mxu0 %v59_v16  ;;  %398 = vmatprep.subr.mxu1 %v194_v19  ;;  %v175_v31 = vld [vmem:[#allocation5 + $0x48] sm:$0xff]  ;;  %v174_v33 = vld [vmem:[#allocation5 + $0x40] sm:$0xff]  ;;  %v189_v34 = vld [vmem:[#allocation5 + $0xb8] sm:$0xff] }
  0x26   :  { %120 = vmatpush1.msra.mxu0 %v58_v18  ;;  %399 = vmatpush3.msra.mxu1 %v178_v21  ;;  %v173_v35 = vld [vmem:[#allocation5 + $0x38] sm:$0xff]  ;;  %v188_v36 = vld [vmem:[#allocation5 + $0xb0] sm:$0xff]  ;;  %v187_v38 = vld [vmem:[#allocation5 + $0xa8] sm:$0xff] }
  0x27   :  { %121 = vmatprep.subr.mxu0 %v57_v20  ;;  %400 = vmatprep.subr.mxu1 %v193_v23  ;;  %v172_v37 = vld [vmem:[#allocation5 + $0x30] sm:$0xff]  ;;  %v171_v39 = vld [vmem:[#allocation5 + $0x28] sm:$0xff]  ;;  %v186_v40 = vld [vmem:[#allocation5 + $0xa0] sm:$0xff] }
  0x28   :  { %122 = vmatpush1.msra.mxu0 %v56_v22  ;;  %401 = vmatpush3.msra.mxu1 %v177_v25  ;;  %v170_v41 = vld [vmem:[#allocation5 + $0x20] sm:$0xff]  ;;  %v185_v42 = vld [vmem:[#allocation5 + $0x98] sm:$0xff]  ;;  %v184_v44 = vld [vmem:[#allocation5 + $0x90] sm:$0xff] }
  0x29   :  { %123 = vmatprep.subr.mxu0 %v55_v24  ;;  %402 = vmatprep.subr.mxu1 %v192_v27  ;;  %v169_v43 = vld [vmem:[#allocation5 + $0x18] sm:$0xff]  ;;  %v168_v45 = vld [vmem:[#allocation5 + $0x10] sm:$0xff]  ;;  %v183_v46 = vld [vmem:[#allocation5 + $0x88] sm:$0xff] }
  0x2a   :  { %124 = vmatpush1.msra.mxu0 %v54_v26  ;;  %403 = vmatpush3.msra.mxu1 %v176_v29  ;;  %v167_v47 = vld [vmem:[#allocation5 + $0x8] sm:$0xff]  ;;  %v182_v48 = vld [vmem:[#allocation5 + $0x80] sm:$0xff]  ;;  %v291_v50 = vld [vmem:[%s736_s5 + $0x78] sm:$0xff] }
  0x2b   :  { %389 = vmatmul.mubr.msk.f32.vlgmr.msra.gmra.mxu0 %vm82_vm1, %v53_v28  ;;  %404 = vmatprep.subr.mxu1 %v191_v30  ;;  %v166_v49 = vld [vmem:[#allocation5] sm:$0xff]  ;;  %v290_v51 = vld [vmem:[%s736_s5 + $0x70] sm:$0xff]  ;;  %v287_v54 = vld [vmem:[%s736_s5 + $0x58] sm:$0xff] }
  0x2c   :  { %444 = vmatprep.subr.mxu0 %v556_v0  ;;  %405 = vmatpush3.msra.mxu1 %v175_v31  ;;  %v289_v52 = vld [vmem:[%s736_s5 + $0x68] sm:$0xff]  ;;  %v288_v53 = vld [vmem:[%s736_s5 + $0x60] sm:$0xff]  ;;  %v286_v55 = vld [vmem:[%s736_s5 + $0x50] sm:$0xff] }
  0x2d   :  { %406 = vmatprep.subr.mxu1 %v190_v32  ;;  %445 = vmatpush3.msra.mxu0 %v291_v50  ;;  %v285_v56 = vld [vmem:[%s736_s5 + $0x48] sm:$0xff]  ;;  %v284_v57 = vld [vmem:[%s736_s5 + $0x40] sm:$0xff]  ;;  %v283_v58 = vld [vmem:[%s736_s5 + $0x38] sm:$0xff] }
  0x2e   :  { %407 = vmatpush3.msra.mxu1 %v174_v33  ;;  %446 = vmatprep.subr.mxu0 %v556_v0  ;;  %v282_v59 = vld [vmem:[%s736_s5 + $0x30] sm:$0xff]  ;;  %v281_v60 = vld [vmem:[%s736_s5 + $0x28] sm:$0xff]  ;;  %v70_v1 = vld [vmem:[#allocation2] sm:$0x3] }
  0x2f   :  { %408 = vmatprep.subr.mxu1 %v189_v34  ;;  %447 = vmatpush3.msra.mxu0 %v290_v51  ;;  %v75_v3 = vrot.slane %v70_v1, %v74_v63  ;;  %v79_v4 = vrot.slane %v70_v1, %v78_v2  ;;  %v280_v11 = vld [vmem:[%s736_s5 + $0x20] sm:$0xff]  ;;  %v279_v12 = vld [vmem:[%s736_s5 + $0x18] sm:$0xff]  ;;  %v278_v13 = vld [vmem:[%s736_s5 + $0x10] sm:$0xff] }
  0x30   :  { %409 = vmatpush3.msra.mxu1 %v173_v35  ;;  %448 = vmatprep.subr.mxu0 %v556_v0  ;;  %v277_v14 = vld [vmem:[%s736_s5 + $0x8] sm:$0xff]  ;;  %v276_v15 = vld [vmem:[%s736_s5] sm:$0xff]  ;;  %s377_s5 = sshll.u32 %s558_s27, 4  ;;  %s378_s5 = int_to_ptr.vmem [resolvable:$true] %s377_s5 }
  0x31   :  { %410 = vmatprep.subr.mxu1 %v188_v36  ;;  %449 = vmatpush3.msra.mxu0 %v289_v52  ;;  %v390_v17 = vld [vmem:[%s735_s4] ss:$0 sm:$0xff]  ;;  %s526_s28 = scalar_lea.vmem %s378_s5, 32  ;;  %p531_p11 = scmp.lt.s32.totalorder %s378_s5, %s378_s5 }
  0x32   :  { %411 = vmatpush3.msra.mxu1 %v172_v37  ;;  %450 = vmatprep.subr.mxu0 %v556_v0  ;;  %v391_v22 = vld [vmem:[%s737_s6] ss:$0 sm:$0xff]  ;;  %p527_p10 = scmp.ne.s32.totalorder %s378_s5, %s526_s28  ;;  %p532_p12 = scmp.lt.s32.totalorder %s526_s28, %s526_s28 }
  0x33   :  { %412 = vmatprep.subr.mxu1 %v187_v38  ;;  %451 = vmatpush3.msra.mxu0 %v288_v53 }
  0x34   :  { %413 = vmatpush3.msra.mxu1 %v171_v39  ;;  %452 = vmatprep.subr.mxu0 %v556_v0  ;;  %p533_p13 = por %p532_p12, %p531_p11 }
  0x35   :  { %414 = vmatprep.subr.mxu1 %v186_v40  ;;  %453 = vmatpush3.msra.mxu0 %v287_v54 }
  0x36   :  { %415 = vmatpush3.msra.mxu1 %v170_v41  ;;  %454 = vmatprep.subr.mxu0 %v556_v0  ;;  %p534_p0 = pnand %p533_p13, %p527_p10 }
  0x37   :  { %416 = vmatprep.subr.mxu1 %v185_v42  ;;  %455 = vmatpush3.msra.mxu0 %v286_v55 }
  0x38   :  { %417 = vmatpush3.msra.mxu1 %v169_v43  ;;  %456 = vmatprep.subr.mxu0 %v556_v0 }
  0x39   :  { %418 = vmatprep.subr.mxu1 %v184_v44  ;;  %457 = vmatpush3.msra.mxu0 %v285_v56 }
  0x3a   :  { %419 = vmatpush3.msra.mxu1 %v168_v45  ;;  %458 = vmatprep.subr.mxu0 %v556_v0 }
  0x3b   :  { %420 = vmatprep.subr.mxu1 %v183_v46  ;;  %459 = vmatpush3.msra.mxu0 %v284_v57 }
  0x3c   :  { %421 = vmatpush3.msra.mxu1 %v167_v47  ;;  %460 = vmatprep.subr.mxu0 %v556_v0 }
  0x3d   :  { %422 = vmatprep.subr.mxu1 %v182_v48  ;;  %461 = vmatpush3.msra.mxu0 %v283_v58 }
  0x3e   :  { %423 = vmatpush3.msra.mxu1 %v166_v49  ;;  %462 = vmatprep.subr.mxu0 %v556_v0 }
  0x3f   :  { %463 = vmatpush3.msra.mxu0 %v282_v59  ;;  %476 = vmatprep.mubr.msk.f32.mxu0 %vm557_vm2, %v556_v0 }
  0x40   :  { %464 = vmatprep.subr.mxu0 %v556_v0 }
  0x41   :  { %465 = vmatpush3.msra.mxu0 %v281_v60 }
  0x42   :  { %466 = vmatprep.subr.mxu0 %v556_v0 }
  0x43   :  { %467 = vmatpush3.msra.mxu0 %v280_v11 }
  0x44   :  { %468 = vmatprep.subr.mxu0 %v556_v0 }
  0x45   :  { %469 = vmatpush3.msra.mxu0 %v279_v12 }
  0x46   :  { %470 = vmatprep.subr.mxu0 %v556_v0 }
  0x47   :  { %471 = vmatpush3.msra.mxu0 %v278_v13 }
  0x48   :  { %472 = vmatprep.subr.mxu0 %v556_v0 }
  0x49   :  { %473 = vmatpush3.msra.mxu0 %v277_v14 }
  0x4a   :  { %474 = vmatprep.subr.mxu0 %v556_v0 }
  0x4b   :  { %475 = vmatpush3.msra.mxu0 %v276_v15 }
  0xeb   :  { %v159_v5 = vpop.f32.mrf.mxu0 }
  0xec   :  { %v160_v6 = vadd.f32 %v159_v5, %v75_v3 }
  0xed   :  { %v161_v7 = vpop.f32.mrf.mxu0 }
  0xee   :  { %v162_v8 = vadd.f32 %v161_v7, %v79_v4  ;;  %v164_v10 = vmax.f32 %v160_v6, 0.0 }
  0xf0   :  { %v165_v9 = vmax.f32 %v162_v8, 0.0 }
  0xf2   :  { %269 = vmatprep.mubr.f32.mxu1 %v165_v9 }
  0xf3   :  { %270 = vmatmul.mubr.f32.vlgmr.msra.gmra.mxu1 %v164_v10 }
 0x1b3   :  { %v424_v16 = vpop.f32.mrf.mxu1 }
 0x1b5   :  { %v425_v18 = vpop.f32.mrf.mxu1 }
 0x1b6   :  { %v426_v19 = vadd.f32 %v425_v18, %v424_v16 }
 0x1b8   :  { %v272_v20 = vadd.f32 %v426_v19, %v390_v17 }
 0x1ba   :  { %v275_v21 = vmax.f32 %v272_v20, 0.0 }
 0x1bc   :  { %477 = vmatmul.mubr.f32.vlgmr.msra.gmra.mxu0 %v275_v21 }
 0x27c   :  { %v365_v23 = vpop.f32.mrf.mxu0 }
 0x27d   :  { %v366_v24 = vadd.f32 %v391_v22, %v365_v23 }
 0x27e   :  { %v478_v0 = vpop.f32.mrf.mxu0 }
 0x27f   :  { %370 = vst.msk [vmem:[#allocation7] sm:$0x3] %vm369_vm3, %v366_v24 }
 0x280   :  { %537 = shalt.err (!%p534_p0)
}
 0x281   :  { %380 = dma.vmem_to_hbm [thread:$0]  %s378_s5, 32, %s738_s7, [#allocation4]  }
 0x282   :  { %550 = dma.done.wait [#allocation4], 32  }
 0x283   :  { %551 = vsyncadd [#allocation4], 4294967264 }
 0x284   :  { %384 = vsyncpa [#allocation3], 1 }
 0x285   :  { %385 = vsyncpa [#allocation6], 1 }
 0x286   :  { %386 = vsyncpa [#allocation4], 1 }

</bundles_post_ra>
